<compile_context>
chip_gen: v6e
topology: v6e:2x2x1
jax: 0.10.0
libtpu: 0.0.40
codegen_flags: <defaults>
</compile_context>

<pallas_src>
import functools

import jax
import jax.numpy as jnp
import numpy as np
from jax.experimental import pallas as pl
from jax.experimental.pallas import tpu as pltpu

LEAKY_SLOPE = 0.01
BN_EPS = 1e-5


def _round_up(a, b):
    return (a + b - 1) // b * b


def _cdiv(a, b):
    return (a + b - 1) // b


def _conv_act(patches_ref, w_ref, b_ref):
    """Shared hot path: conv-as-matmul (bf16 operands, f32 acc) + bias + LeakyReLU."""
    y = jnp.dot(patches_ref[...], w_ref[...], preferred_element_type=jnp.float32)
    y = y + b_ref[...]
    return jnp.where(y >= 0, y, LEAKY_SLOPE * y)


def _stats_kernel(patches_ref, w_ref, b_ref, c_ref, sum_ref, sq_ref):
    """Pass 1: shifted per-channel sum / sum-of-squares of the activation.

    Accumulates t = y - c with c = leaky_relu(bias):
      * zero-padded patch rows give y == c exactly -> contribute 0 (no mask),
      * the shift keeps the f32 E[t^2] - E[t]^2 variance cancellation-safe.
    """
    @pl.when(pl.program_id(1) == 0)
    def _init():
        sum_ref[...] = jnp.zeros_like(sum_ref)
        sq_ref[...] = jnp.zeros_like(sq_ref)

    t = _conv_act(patches_ref, w_ref, b_ref) - c_ref[...]
    lanes = t.shape[-1]
    t8 = t.reshape(-1, 8, lanes)             # sublane-aligned regroup (layout-free)
    sum_ref[...] += jnp.sum(t8, axis=0)[None]
    sq_ref[...] += jnp.sum(t8 * t8, axis=0)[None]


def _apply_kernel(patches_ref, w_ref, b_ref, scale_ref, shift_ref, out_ref):
    """Pass 2: conv + bias + LeakyReLU + BatchNorm scale/shift (fully parallel)."""
    y = _conv_act(patches_ref, w_ref, b_ref)
    out_ref[...] = (y * scale_ref[...] + shift_ref[...]).astype(out_ref.dtype)


def _im2col_bf16(x_nchw, k, stride, pad, ho, wo, m_pad):
    """bf16 im2col with the row padding fused into the same producer.

    The (m_pad, k*k*Cin) patch matrix is built directly in bf16 (cast happens
    before any slicing/concat, so no f32 intermediate of the dominant tensor
    is ever materialized) and padded to m_pad rows in the same fused producer.
    """
    n, cin, _, _ = x_nchw.shape
    x = jnp.transpose(x_nchw, (0, 2, 3, 1)).astype(jnp.bfloat16)      # NHWC bf16
    x = jnp.pad(x, ((0, 0), (pad, pad), (pad, pad), (0, 0)))
    cols = [x[:, kh:kh + stride * ho:stride, kw:kw + stride * wo:stride, :]
            for kh in range(k) for kw in range(k)]                    # (N,Ho,Wo,Cin) each
    patches = jnp.concatenate(cols, axis=-1).reshape(n * ho * wo, k * k * cin)
    return jnp.pad(patches, ((0, m_pad - n * ho * wo), (0, 0)))


@functools.partial(jax.jit, static_argnames=("kernel_size", "stride", "padding"))
def lazy_conv_block(x_nchw, weight_oihw, bias, gamma, beta,
                    kernel_size=3, stride=2, padding=1):
    """Forward pass of LazyConvBlock (downsample).  x: NCHW f32."""
    n, cin, h, w = x_nchw.shape
    cout = weight_oihw.shape[0]
    k = kernel_size
    kkc = k * k * cin
    ho = (h + 2 * padding - k) // stride + 1
    wo = (w + 2 * padding - k) // stride + 1
    m_real = n * ho * wo

    # Lane-dense packing: `pack` output pixels share one 128-lane row.
    # NOTE: if cout does not divide 128 we fall back to pack=1 -- correct, but
    # narrow masked stores (off the fast path the comments assume).
    pack = 128 // cout if (cout <= 128 and 128 % cout == 0) else 1
    lanes = pack * cout
    dk = pack * kkc

    # Tile sizing (lane-dense rows).  1024-row tiles: patches 0.56 MiB + out
    # 0.5 MiB per buffer -> ~2.5 MiB double-buffered; fits every generation's
    # scoped VMEM default, so no vmem_limit_bytes needed.
    md = _cdiv(m_real, pack)
    tmr = min(1024, _round_up(md, 16))
    n_tiles = _cdiv(md, tmr)
    ncore = 2 if n_tiles >= 2 else 1          # megacore split of pass 1 (v7x)
    n_tiles = _round_up(n_tiles, ncore)
    steps = n_tiles // ncore
    mdp = n_tiles * tmr
    m_pad = mdp * pack

    patches_d = _im2col_bf16(x_nchw, k, stride, padding, ho, wo, m_pad).reshape(mdp, dk)

    # (Cout, Cin, kh, kw) -> (kh, kw, Cin, Cout) -> 2-D matching patch column
    # order, then block-diagonal expansion for the lane-dense matmul.
    w2d = jnp.transpose(weight_oihw, (2, 3, 1, 0)).reshape(kkc, cout)
    w_big = jnp.kron(jnp.eye(pack, dtype=w2d.dtype), w2d).astype(jnp.bfloat16)
    bias_d = jnp.tile(bias, pack).reshape(1, lanes)

    # Per-channel shift for the statistics: c = leaky_relu(bias).
    c = jnp.where(bias >= 0, bias, LEAKY_SLOPE * bias)
    c_d = jnp.tile(c, pack).reshape(1, lanes)

    # ---- Pass 1: batch statistics (reduction over M; per-core accumulators).
    patches_spec1 = pl.BlockSpec((tmr, dk), lambda cix, i: (cix * steps + i, 0))
    w_spec1 = pl.BlockSpec((dk, lanes), lambda cix, i: (0, 0))
    vec_spec1 = pl.BlockSpec((1, lanes), lambda cix, i: (0, 0))
    acc_spec = pl.BlockSpec((1, 8, lanes), lambda cix, i: (cix, 0, 0))

    sums, sqs = pl.pallas_call(
        _stats_kernel,
        out_shape=(jax.ShapeDtypeStruct((ncore, 8, lanes), jnp.float32),
                   jax.ShapeDtypeStruct((ncore, 8, lanes), jnp.float32)),
        grid_spec=pltpu.PrefetchScalarGridSpec(
            num_scalar_prefetch=0, grid=(ncore, steps),
            in_specs=[patches_spec1, w_spec1, vec_spec1, vec_spec1],
            out_specs=(acc_spec, acc_spec)),
        compiler_params=pltpu.CompilerParams(
            dimension_semantics=("parallel", "arbitrary")),
    )(patches_d, w_big, bias_d, c_d)

    # Fold core halves / sublanes / pack replicas; precompute scale & shift.
    sum_c = sums.reshape(-1, pack, cout).sum(axis=(0, 1))
    sq_c = sqs.reshape(-1, pack, cout).sum(axis=(0, 1))
    mean_t = sum_c / m_real                                   # mean of (y - c)
    mean = c + mean_t
    var = jnp.maximum(sq_c / m_real - mean_t * mean_t, 0.0)   # biased (training BN)
    inv_std = jax.lax.rsqrt(var + BN_EPS)
    scale = gamma * inv_std
    shift = beta - mean * scale
    scale_d = jnp.tile(scale, pack).reshape(1, lanes)
    shift_d = jnp.tile(shift, pack).reshape(1, lanes)

    # ---- Pass 2: recompute conv + apply normalization (parallel over M,
    # megacore-sharded automatically via "parallel").
    patches_spec2 = pl.BlockSpec((tmr, dk), lambda i: (i, 0))
    w_spec2 = pl.BlockSpec((dk, lanes), lambda i: (0, 0))
    vec_spec2 = pl.BlockSpec((1, lanes), lambda i: (0, 0))

    out_d = pl.pallas_call(
        _apply_kernel,
        out_shape=jax.ShapeDtypeStruct((mdp, lanes), jnp.float32),
        grid_spec=pltpu.PrefetchScalarGridSpec(
            num_scalar_prefetch=0, grid=(n_tiles,),
            in_specs=[patches_spec2, w_spec2, vec_spec2, vec_spec2, vec_spec2],
            out_specs=pl.BlockSpec((tmr, lanes), lambda i: (i, 0))),
        compiler_params=pltpu.CompilerParams(
            dimension_semantics=("parallel",)),
    )(patches_d, w_big, bias_d, scale_d, shift_d)

    # (M, Cout) -> NCHW (module output contract); drop padded rows.
    out = out_d.reshape(m_pad, cout)[:m_real]
    return jnp.transpose(out.reshape(n, ho, wo, cout), (0, 3, 1, 2))


def _reference(x, w, b, gamma, beta, stride=2, padding=1,
               round_matmul_to_bf16=False):
    """Pure-JAX reference of the same forward.

    With round_matmul_to_bf16=True the conv operands are rounded to bf16 (but
    accumulated in f32), matching the kernel's MXU path up to accumulation order.
    """
    if round_matmul_to_bf16:
        x = x.astype(jnp.bfloat16).astype(jnp.float32)
        w = w.astype(jnp.bfloat16).astype(jnp.float32)
    y = jax.lax.conv_general_dilated(
        x, w, window_strides=(stride, stride),
        padding=((padding, padding), (padding, padding)),
        dimension_numbers=("NCHW", "OIHW", "NCHW"),
        precision=jax.lax.Precision.HIGHEST)
    y = y + b[None, :, None, None]
    y = jnp.where(y >= 0, y, LEAKY_SLOPE * y)
    mean = jnp.mean(y, axis=(0, 2, 3), keepdims=True)
    var = jnp.mean((y - mean) ** 2, axis=(0, 2, 3), keepdims=True)
    y = (y - mean) * jax.lax.rsqrt(var + BN_EPS)
    return y * gamma[None, :, None, None] + beta[None, :, None, None]


if __name__ == "__main__":
    # Small shapes consistent with the module: NCHW input, out_features=16.
    N, CIN, H, W = 2, 4, 16, 16
    COUT, K = 16, 3

    key = jax.random.PRNGKey(0)
    kx, kw, kb = jax.random.split(key, 3)

    x = jax.random.normal(kx, (N, CIN, H, W), dtype=jnp.float32)

    # Deterministic parameter init (kaiming-uniform-like bound, as in PyTorch Conv2d).
    fan_in = CIN * K * K
    bound = 1.0 / np.sqrt(fan_in)
    weight = jax.random.uniform(kw, (COUT, CIN, K, K), jnp.float32, -bound, bound)
    bias = jax.random.uniform(kb, (COUT,), jnp.float32, -bound, bound)
    gamma = jnp.ones((COUT,), jnp.float32)   # BatchNorm2d default weight
    beta = jnp.zeros((COUT,), jnp.float32)   # BatchNorm2d default bias

    out = jax.block_until_ready(lazy_conv_block(x, weight, bias, gamma, beta))
    assert out.shape == (N, COUT, H // 2, W // 2), out.shape

    # Tight check against a reference with the same bf16-rounded matmul operands.
    ref_bf16 = jax.block_until_ready(
        _reference(x, weight, bias, gamma, beta, round_matmul_to_bf16=True))
    np.testing.assert_allclose(np.asarray(out), np.asarray(ref_bf16),
                               rtol=2e-3, atol=2e-3)
    # Loose check against the full-f32 PyTorch semantics (bf16 MXU operands
    # are a deliberate perf choice; error stays well inside this band).
    ref_f32 = jax.block_until_ready(
        _reference(x, weight, bias, gamma, beta, round_matmul_to_bf16=False))
    np.testing.assert_allclose(np.asarray(out), np.asarray(ref_f32),
                               rtol=5e-2, atol=5e-2)

    # A second, non-multiple-of-8 spatial size to exercise padded-row handling
    # (padded rows contribute exactly zero to the shifted statistics).
    x2 = jax.random.normal(jax.random.PRNGKey(1), (1, CIN, 14, 14), jnp.float32)
    out2 = jax.block_until_ready(lazy_conv_block(x2, weight, bias, gamma, beta))
    ref2 = jax.block_until_ready(
        _reference(x2, weight, bias, gamma, beta, round_matmul_to_bf16=True))
    assert out2.shape == (1, COUT, 7, 7), out2.shape
    np.testing.assert_allclose(np.asarray(out2), np.asarray(ref2),
                               rtol=2e-3, atol=2e-3)

    print("KERNEL_OK")
</pallas_src>

<mosaic_0001>
module attributes {stable_mosaic.version = 11 : i64} {
  func.func @_stats_kernel(%arg0: i32, %arg1: i32, %arg2: memref<16x288xbf16, #tpu.memory_space<vmem>>, %arg3: memref<288x128xbf16, #tpu.memory_space<vmem>>, %arg4: memref<1x128xf32, #tpu.memory_space<vmem>>, %arg5: memref<1x128xf32, #tpu.memory_space<vmem>>, %arg6: memref<1x8x128xf32, #tpu.memory_space<vmem>>, %arg7: memref<1x8x128xf32, #tpu.memory_space<vmem>>) attributes {dimension_semantics = [#tpu.dimension_semantics<parallel>, #tpu.dimension_semantics<arbitrary>], iteration_bounds = array<i64: 1, 1>, scalar_prefetch = 0 : i64, scratch_operands = 0 : i64, tpu.core_type = #tpu.core_type<tc>, window_params = [{transform_indices = @transform_0, window_bounds = array<i64: 16, 288>}, {pipeline_mode = #tpu.pipeline_mode<synchronous>, transform_indices = @transform_1, window_bounds = array<i64: 288, 128>}, {pipeline_mode = #tpu.pipeline_mode<synchronous>, transform_indices = @transform_2, window_bounds = array<i64: 1, 128>}, {pipeline_mode = #tpu.pipeline_mode<synchronous>, transform_indices = @transform_3, window_bounds = array<i64: 1, 128>}, {transform_indices = @transform_4, window_bounds = array<i64: 1, 8, 128>}, {transform_indices = @transform_5, window_bounds = array<i64: 1, 8, 128>}]} {
    %c0_i32 = arith.constant 0 : i32
    %0 = arith.cmpi eq, %arg1, %c0_i32 : i32
    %1 = arith.extui %0 : i1 to i32
    %c0_i32_0 = arith.constant 0 : i32
    %2 = arith.cmpi ne, %1, %c0_i32_0 : i32
    scf.if %2 {
      %cst_24 = arith.constant 0.000000e+00 : f32
      %29 = vector.broadcast %cst_24 : f32 to vector<1x8x128xf32>
      %c0_25 = arith.constant 0 : index
      %c0_26 = arith.constant 0 : index
      %c0_27 = arith.constant 0 : index
      %30 = vector.load %arg6[%c0_25, %c0_26, %c0_27] : memref<1x8x128xf32, #tpu.memory_space<vmem>>, vector<1x8x128xf32>
      tpu.vector_store %arg6[%c0_25, %c0_26, %c0_27], %29 {strides = array<i32>} : memref<1x8x128xf32, #tpu.memory_space<vmem>>, vector<1x8x128xf32>,
      %cst_28 = arith.constant 0.000000e+00 : f32
      %31 = vector.broadcast %cst_28 : f32 to vector<1x8x128xf32>
      %c0_29 = arith.constant 0 : index
      %c0_30 = arith.constant 0 : index
      %c0_31 = arith.constant 0 : index
      %32 = vector.load %arg7[%c0_29, %c0_30, %c0_31] : memref<1x8x128xf32, #tpu.memory_space<vmem>>, vector<1x8x128xf32>
      tpu.vector_store %arg7[%c0_29, %c0_30, %c0_31], %31 {strides = array<i32>} : memref<1x8x128xf32, #tpu.memory_space<vmem>>, vector<1x8x128xf32>,
    } else {
    }
    %c0 = arith.constant 0 : index
    %c0_1 = arith.constant 0 : index
    %3 = vector.load %arg2[%c0, %c0_1] : memref<16x288xbf16, #tpu.memory_space<vmem>>, vector<16x288xbf16>
    %c0_2 = arith.constant 0 : index
    %c0_3 = arith.constant 0 : index
    %4 = vector.load %arg3[%c0_2, %c0_3] : memref<288x128xbf16, #tpu.memory_space<vmem>>, vector<288x128xbf16>
    %cst = arith.constant dense<0.000000e+00> : vector<16x128xf32>
    %5 = tpu.matmul %3, %4, %cst {dimension_numbers = #tpu.dot_dimension_numbers<[1], [0], [0], [1], [0, 0, 1, 1], [], []>} : vector<16x288xbf16>, vector<288x128xbf16>, vector<16x128xf32> -> vector<16x128xf32>
    %c0_4 = arith.constant 0 : index
    %c0_5 = arith.constant 0 : index
    %6 = vector.load %arg4[%c0_4, %c0_5] : memref<1x128xf32, #tpu.memory_space<vmem>>, vector<1x128xf32>
    %7 = vector.broadcast %6 : vector<1x128xf32> to vector<16x128xf32>
    %8 = arith.addf %5, %7 : vector<16x128xf32>
    %cst_6 = arith.constant 0.000000e+00 : f32
    %9 = vector.broadcast %cst_6 : f32 to vector<16x128xf32>
    %10 = arith.cmpf oge, %8, %9 : vector<16x128xf32>
    %cst_7 = arith.constant 0.00999999977 : f32
    %11 = vector.broadcast %cst_7 : f32 to vector<16x128xf32>
    %12 = arith.mulf %11, %8 : vector<16x128xf32>
    %13 = arith.select %10, %8, %12 : vector<16x128xi1>, vector<16x128xf32>
    %c0_8 = arith.constant 0 : index
    %c0_9 = arith.constant 0 : index
    %14 = vector.load %arg5[%c0_8, %c0_9] : memref<1x128xf32, #tpu.memory_space<vmem>>, vector<1x128xf32>
    %15 = vector.broadcast %14 : vector<1x128xf32> to vector<16x128xf32>
    %16 = arith.subf %13, %15 : vector<16x128xf32>
    %17 = vector.shape_cast %16 : vector<16x128xf32> to vector<2x8x128xf32>
    %c0_10 = arith.constant 0 : index
    %c0_11 = arith.constant 0 : index
    %c0_12 = arith.constant 0 : index
    %18 = vector.load %arg6[%c0_10, %c0_11, %c0_12] : memref<1x8x128xf32, #tpu.memory_space<vmem>>, vector<1x8x128xf32>
    %cst_13 = arith.constant dense<0.000000e+00> : vector<8x128xf32>
    %19 = vector.multi_reduction <add>, %17, %cst_13 [0] : vector<2x8x128xf32> to vector<8x128xf32>
    %20 = vector.shape_cast %19 : vector<8x128xf32> to vector<1x8x128xf32>
    %21 = arith.addf %18, %20 : vector<1x8x128xf32>
    %c0_14 = arith.constant 0 : index
    %c0_15 = arith.constant 0 : index
    %c0_16 = arith.constant 0 : index
    %22 = vector.load %arg6[%c0_14, %c0_15, %c0_16] : memref<1x8x128xf32, #tpu.memory_space<vmem>>, vector<1x8x128xf32>
    tpu.vector_store %arg6[%c0_14, %c0_15, %c0_16], %21 {strides = array<i32>} : memref<1x8x128xf32, #tpu.memory_space<vmem>>, vector<1x8x128xf32>,
    %c0_17 = arith.constant 0 : index
    %c0_18 = arith.constant 0 : index
    %c0_19 = arith.constant 0 : index
    %23 = vector.load %arg7[%c0_17, %c0_18, %c0_19] : memref<1x8x128xf32, #tpu.memory_space<vmem>>, vector<1x8x128xf32>
    %24 = arith.mulf %17, %17 : vector<2x8x128xf32>
    %cst_20 = arith.constant dense<0.000000e+00> : vector<8x128xf32>
    %25 = vector.multi_reduction <add>, %24, %cst_20 [0] : vector<2x8x128xf32> to vector<8x128xf32>
    %26 = vector.shape_cast %25 : vector<8x128xf32> to vector<1x8x128xf32>
    %27 = arith.addf %23, %26 : vector<1x8x128xf32>
    %c0_21 = arith.constant 0 : index
    %c0_22 = arith.constant 0 : index
    %c0_23 = arith.constant 0 : index
    %28 = vector.load %arg7[%c0_21, %c0_22, %c0_23] : memref<1x8x128xf32, #tpu.memory_space<vmem>>, vector<1x8x128xf32>
    tpu.vector_store %arg7[%c0_21, %c0_22, %c0_23], %27 {strides = array<i32>} : memref<1x8x128xf32, #tpu.memory_space<vmem>>, vector<1x8x128xf32>,
    return
  }
  func.func @transform_0(%arg0: i32, %arg1: i32) -> (i32, i32) {
    %c1_i32 = arith.constant 1 : i32
    %0 = arith.muli %arg0, %c1_i32 : i32
    %1 = arith.addi %0, %arg1 : i32
    %c0_i32 = arith.constant 0 : i32
    %c0_i32_0 = arith.constant 0 : i32
    return %1, %c0_i32 : i32, i32
  }
  func.func @transform_1(%arg0: i32, %arg1: i32) -> (i32, i32) {
    %c0_i32 = arith.constant 0 : i32
    %c0_i32_0 = arith.constant 0 : i32
    %c0_i32_1 = arith.constant 0 : i32
    return %c0_i32, %c0_i32_0 : i32, i32
  }
  func.func @transform_2(%arg0: i32, %arg1: i32) -> (i32, i32) {
    %c0_i32 = arith.constant 0 : i32
    %c0_i32_0 = arith.constant 0 : i32
    %c0_i32_1 = arith.constant 0 : i32
    return %c0_i32, %c0_i32_0 : i32, i32
  }
  func.func @transform_3(%arg0: i32, %arg1: i32) -> (i32, i32) {
    %c0_i32 = arith.constant 0 : i32
    %c0_i32_0 = arith.constant 0 : i32
    %c0_i32_1 = arith.constant 0 : i32
    return %c0_i32, %c0_i32_0 : i32, i32
  }
  func.func @transform_4(%arg0: i32, %arg1: i32) -> (i32, i32, i32) {
    %c0_i32 = arith.constant 0 : i32
    %c0_i32_0 = arith.constant 0 : i32
    %c0_i32_1 = arith.constant 0 : i32
    return %arg0, %c0_i32, %c0_i32_0 : i32, i32, i32
  }
  func.func @transform_5(%arg0: i32, %arg1: i32) -> (i32, i32, i32) {
    %c0_i32 = arith.constant 0 : i32
    %c0_i32_0 = arith.constant 0 : i32
    %c0_i32_1 = arith.constant 0 : i32
    return %arg0, %c0_i32, %c0_i32_0 : i32, i32, i32
  }
}

module attributes {stable_mosaic.version = 11 : i64} {
  func.func @_apply_kernel(%arg0: i32, %arg1: memref<16x288xbf16, #tpu.memory_space<vmem>>, %arg2: memref<288x128xbf16, #tpu.memory_space<vmem>>, %arg3: memref<1x128xf32, #tpu.memory_space<vmem>>, %arg4: memref<1x128xf32, #tpu.memory_space<vmem>>, %arg5: memref<1x128xf32, #tpu.memory_space<vmem>>, %arg6: memref<16x128xf32, #tpu.memory_space<vmem>>) attributes {dimension_semantics = [#tpu.dimension_semantics<parallel>], iteration_bounds = array<i64: 1>, scalar_prefetch = 0 : i64, scratch_operands = 0 : i64, tpu.core_type = #tpu.core_type<tc>, window_params = [{transform_indices = @transform_0, window_bounds = array<i64: 16, 288>}, {pipeline_mode = #tpu.pipeline_mode<synchronous>, transform_indices = @transform_1, window_bounds = array<i64: 288, 128>}, {pipeline_mode = #tpu.pipeline_mode<synchronous>, transform_indices = @transform_2, window_bounds = array<i64: 1, 128>}, {pipeline_mode = #tpu.pipeline_mode<synchronous>, transform_indices = @transform_3, window_bounds = array<i64: 1, 128>}, {pipeline_mode = #tpu.pipeline_mode<synchronous>, transform_indices = @transform_4, window_bounds = array<i64: 1, 128>}, {transform_indices = @transform_5, window_bounds = array<i64: 16, 128>}]} {
    %c0 = arith.constant 0 : index
    %c0_0 = arith.constant 0 : index
    %0 = vector.load %arg1[%c0, %c0_0] : memref<16x288xbf16, #tpu.memory_space<vmem>>, vector<16x288xbf16>
    %c0_1 = arith.constant 0 : index
    %c0_2 = arith.constant 0 : index
    %1 = vector.load %arg2[%c0_1, %c0_2] : memref<288x128xbf16, #tpu.memory_space<vmem>>, vector<288x128xbf16>
    %cst = arith.constant dense<0.000000e+00> : vector<16x128xf32>
    %2 = tpu.matmul %0, %1, %cst {dimension_numbers = #tpu.dot_dimension_numbers<[1], [0], [0], [1], [0, 0, 1, 1], [], []>} : vector<16x288xbf16>, vector<288x128xbf16>, vector<16x128xf32> -> vector<16x128xf32>
    %c0_3 = arith.constant 0 : index
    %c0_4 = arith.constant 0 : index
    %3 = vector.load %arg3[%c0_3, %c0_4] : memref<1x128xf32, #tpu.memory_space<vmem>>, vector<1x128xf32>
    %4 = vector.broadcast %3 : vector<1x128xf32> to vector<16x128xf32>
    %5 = arith.addf %2, %4 : vector<16x128xf32>
    %cst_5 = arith.constant 0.000000e+00 : f32
    %6 = vector.broadcast %cst_5 : f32 to vector<16x128xf32>
    %7 = arith.cmpf oge, %5, %6 : vector<16x128xf32>
    %cst_6 = arith.constant 0.00999999977 : f32
    %8 = vector.broadcast %cst_6 : f32 to vector<16x128xf32>
    %9 = arith.mulf %8, %5 : vector<16x128xf32>
    %10 = arith.select %7, %5, %9 : vector<16x128xi1>, vector<16x128xf32>
    %c0_7 = arith.constant 0 : index
    %c0_8 = arith.constant 0 : index
    %11 = vector.load %arg4[%c0_7, %c0_8] : memref<1x128xf32, #tpu.memory_space<vmem>>, vector<1x128xf32>
    %12 = vector.broadcast %11 : vector<1x128xf32> to vector<16x128xf32>
    %13 = arith.mulf %10, %12 : vector<16x128xf32>
    %c0_9 = arith.constant 0 : index
    %c0_10 = arith.constant 0 : index
    %14 = vector.load %arg5[%c0_9, %c0_10] : memref<1x128xf32, #tpu.memory_space<vmem>>, vector<1x128xf32>
    %15 = vector.broadcast %14 : vector<1x128xf32> to vector<16x128xf32>
    %16 = arith.addf %13, %15 : vector<16x128xf32>
    %c0_11 = arith.constant 0 : index
    %c0_12 = arith.constant 0 : index
    %17 = vector.load %arg6[%c0_11, %c0_12] : memref<16x128xf32, #tpu.memory_space<vmem>>, vector<16x128xf32>
    tpu.vector_store %arg6[%c0_11, %c0_12], %16 {strides = array<i32>} : memref<16x128xf32, #tpu.memory_space<vmem>>, vector<16x128xf32>,
    return
  }
  func.func @transform_0(%arg0: i32) -> (i32, i32) {
    %c0_i32 = arith.constant 0 : i32
    %c0_i32_0 = arith.constant 0 : i32
    return %arg0, %c0_i32 : i32, i32
  }
  func.func @transform_1(%arg0: i32) -> (i32, i32) {
    %c0_i32 = arith.constant 0 : i32
    %c0_i32_0 = arith.constant 0 : i32
    %c0_i32_1 = arith.constant 0 : i32
    return %c0_i32, %c0_i32_0 : i32, i32
  }
  func.func @transform_2(%arg0: i32) -> (i32, i32) {
    %c0_i32 = arith.constant 0 : i32
    %c0_i32_0 = arith.constant 0 : i32
    %c0_i32_1 = arith.constant 0 : i32
    return %c0_i32, %c0_i32_0 : i32, i32
  }
  func.func @transform_3(%arg0: i32) -> (i32, i32) {
    %c0_i32 = arith.constant 0 : i32
    %c0_i32_0 = arith.constant 0 : i32
    %c0_i32_1 = arith.constant 0 : i32
    return %c0_i32, %c0_i32_0 : i32, i32
  }
  func.func @transform_4(%arg0: i32) -> (i32, i32) {
    %c0_i32 = arith.constant 0 : i32
    %c0_i32_0 = arith.constant 0 : i32
    %c0_i32_1 = arith.constant 0 : i32
    return %c0_i32, %c0_i32_0 : i32, i32
  }
  func.func @transform_5(%arg0: i32) -> (i32, i32) {
    %c0_i32 = arith.constant 0 : i32
    %c0_i32_0 = arith.constant 0 : i32
    return %arg0, %c0_i32 : i32, i32
  }
}

</mosaic_0001>

<bundles_post_ra>
// kernel: mul.4
= control target key start
LH: loop header
LB: loop body
LE: loop exit
PB: predicated region body
PF: predicated region fallthrough
CT: control target
= control target key end

     0   :  { %vm47_vm0 = vcmask 130048   ;;  %s185_s0 = inlined_call_operand.vmem [shape: f32[3,3,4,16], index: 0, kind: input, shape index: {}]   ;;  %s186_s1 = inlined_call_operand.vmem [shape: f32[36,16], index: 1, kind: output, shape index: {}]  }
   0x1   :  { %v96_v0 = vld [vmem:[%s185_s0 + $0x20] sm:$0xf]  ;;  %v97_v1 = vld [vmem:[%s185_s0 + $0x1c] sm:$0xf]  ;;  %v98_v2 = vld [vmem:[%s185_s0 + $0x18] sm:$0xf] }
   0x2   :  { %9 = vst [vmem:[#allocation0 + $0x10] sm:$0xf] %v96_v0  ;;  %14 = vst [vmem:[#allocation0 + $0x40] sm:$0xf] %v97_v1  ;;  %v99_v3 = vld [vmem:[%s185_s0 + $0x14] sm:$0xf] }
   0x3   :  { %19 = vst [vmem:[#allocation0 + $0x28] sm:$0xf] %v98_v2  ;;  %v100_v4 = vld [vmem:[%s185_s0 + $0x10] sm:$0xf]  ;;  %v101_v5 = vld [vmem:[%s185_s0 + $0xc] sm:$0xf] }
   0x4   :  { %24 = vst [vmem:[#allocation0 + $0x30] sm:$0xf] %v99_v3  ;;  %29 = vst [vmem:[#allocation0 + $0x20] sm:$0xf] %v100_v4  ;;  %v102_v6 = vld [vmem:[%s185_s0 + $0x8] sm:$0xf] }
   0x5   :  { %34 = vst [vmem:[#allocation0 + $0x18] sm:$0xf] %v101_v5  ;;  %v103_v7 = vld [vmem:[%s185_s0 + $0x4] sm:$0xf]  ;;  %v44_v8 = vld [vmem:[%s185_s0] sm:$0xf] }
   0x6   :  { %39 = vst [vmem:[#allocation0] sm:$0xf] %v102_v6  ;;  %43 = vst [vmem:[#allocation0 + $0x8] sm:$0xf] %v103_v7 }
   0x7   :  { %45 = vst [vmem:[#allocation0 + $0x38] sm:$0xf] %v44_v8 }
   0x9   :  { %v80_v10 = vld [vmem:[#allocation0 + $0x40] sm:$0xf]   ;;  %v85_v11 = vld [vmem:[#allocation0 + $0x10] sm:$0xf]  }
   0xa   :  { %v75_v9 = vld [vmem:[#allocation0 + $0x28] sm:$0xf]   ;;  %110 = vst.msk [vmem:[%s186_s1 + $0x1c] sm:$0xf] %vm47_vm0, %v80_v10   ;;  %111 = vst.msk [vmem:[%s186_s1 + $0x20] sm:$0xf] %vm47_vm0, %v85_v11  }
   0xb   :  { %v65_v13 = vld [vmem:[#allocation0 + $0x20] sm:$0xf]   ;;  %v70_v14 = vld [vmem:[#allocation0 + $0x30] sm:$0xf]   ;;  %109 = vst.msk [vmem:[%s186_s1 + $0x18] sm:$0xf] %vm47_vm0, %v75_v9  }
   0xc   :  { %v60_v12 = vld [vmem:[#allocation0 + $0x18] sm:$0xf]   ;;  %107 = vst.msk [vmem:[%s186_s1 + $0x10] sm:$0xf] %vm47_vm0, %v65_v13   ;;  %108 = vst.msk [vmem:[%s186_s1 + $0x14] sm:$0xf] %vm47_vm0, %v70_v14  }
   0xd   :  { %v50_v16 = vld [vmem:[#allocation0 + $0x8] sm:$0xf]   ;;  %v55_v17 = vld [vmem:[#allocation0] sm:$0xf]   ;;  %106 = vst.msk [vmem:[%s186_s1 + $0xc] sm:$0xf] %vm47_vm0, %v60_v12  }
   0xe   :  { %v46_v15 = vld [vmem:[#allocation0 + $0x38] sm:$0xf]   ;;  %104 = vst.msk [vmem:[%s186_s1 + $0x4] sm:$0xf] %vm47_vm0, %v50_v16   ;;  %105 = vst.msk [vmem:[%s186_s1 + $0x8] sm:$0xf] %vm47_vm0, %v55_v17  }
   0xf   :  { %48 = vst.msk [vmem:[%s186_s1] sm:$0xf] %vm47_vm0, %v46_v15  }

// kernel: tile.23
= control target key start
LH: loop header
LB: loop body
LE: loop exit
PB: predicated region body
PF: predicated region fallthrough
CT: control target
= control target key end

     0   :  { %s22_s0 = inlined_call_operand.vmem [shape: f32[16], index: 0, kind: input, shape index: {}]   ;;  %s23_s1 = inlined_call_operand.vmem [shape: f32[8,16], index: 1, kind: output, shape index: {}]  }
   0x1   :  { %v4_v0 = vld [vmem:[%s22_s0] ss:$0 sm:$0xff] }
   0x2   :  { %5 = vst [vmem:[%s23_s1] sm:$0xff] %v4_v0 }

// kernel: tile.24
= control target key start
LH: loop header
LB: loop body
LE: loop exit
PB: predicated region body
PF: predicated region fallthrough
CT: control target
= control target key end

     0   :  { %s69_s10 = smov 112   ;;  %s70_s11 = smov 80   ;;  %vm3_vm0 = vcmask 130048   ;;  %vm9_vm1 = vcmask 1048448   ;;  %vm15_vm2 = vcmask 917248   ;;  %vm21_vm3 = vcmask 786048   ;;  %s113_s0 = inlined_call_operand.vmem [shape: f32[8,16], index: 0, kind: input, shape index: {}]   ;;  %s114_s1 = inlined_call_operand.vmem [shape: f32[1,128], index: 1, kind: output, shape index: {}]  }
   0x1   :  { %v55_v0 = vld [vmem:[%s113_s0 + $0x7] sm:$0x1]   ;;  %v57_v1 = vld [vmem:[%s113_s0 + $0x5] sm:$0x1]   ;;  %v56_v2 = vld [vmem:[%s113_s0 + $0x6] sm:$0x1]  }
   0x2   :  { %7 = vrot.lane.b32.xlu0 %v55_v0, %s69_s10  ;;  %19 = vrot.lane.b32.xlu1 %v57_v1, %s70_s11  ;;  %v58_v3 = vld [vmem:[%s113_s0 + $0x4] sm:$0x1]   ;;  %v2_v4 = vld [vmem:[%s113_s0] sm:$0x1]   ;;  %s71_s18 = smov 96   ;;  %s72_s19 = smov 64  }
   0x3   :  { %4 = vst.msk [vmem:[#allocation0] sm:$0x1] %vm3_vm0, %v2_v4   ;;  %v59_v5 = vld [vmem:[%s113_s0 + $0x3] sm:$0x1]   ;;  %v60_v6 = vld [vmem:[%s113_s0 + $0x2] sm:$0x1]  }
   0x4   :  { %s73_s24 = smov 48   ;;  %s74_s25 = smov 32   ;;  %v61_v7 = vld [vmem:[%s113_s0 + $0x1] sm:$0x1]   ;;  %vm27_vm4 = vcmask 654848   ;;  %vm33_vm5 = vcmask 523648  }
   0x5   :  { %s75_s0 = smov 16   ;;  %vm39_vm6 = vcmask 392448   ;;  %vm45_vm7 = vcmask 261248  }
   0x6   :  { %13 = vrot.lane.b32.xlu0 %v56_v2, %s71_s18  ;;  %25 = vrot.lane.b32.xlu1 %v58_v3, %s72_s19 }
   0xa   :  { %31 = vrot.lane.b32.xlu0 %v59_v5, %s73_s24  ;;  %37 = vrot.lane.b32.xlu1 %v60_v6, %s74_s25 }
   0xe   :  { %43 = vrot.lane.b32.xlu0 %v61_v7, %s75_s0 }
  0x74   :  { %v8_v8 = vpop.permute.xlu0 %7   ;;  %v20_v9 = vpop.permute.xlu1 %19  }
  0x75   :  { %10 = vst.msk [vmem:[#allocation0] sm:$0x1] %vm9_vm1, %v8_v8  }
  0x78   :  { %v14_v10 = vpop.permute.xlu0 %13   ;;  %v26_v11 = vpop.permute.xlu1 %25  }
  0x79   :  { %16 = vst.msk [vmem:[#allocation0] sm:$0x1] %vm15_vm2, %v14_v10  }
  0x7a   :  { %22 = vst.msk [vmem:[#allocation0] sm:$0x1] %vm21_vm3, %v20_v9  }
  0x7b   :  { %28 = vst.msk [vmem:[#allocation0] sm:$0x1] %vm27_vm4, %v26_v11  }
  0x7c   :  { %v32_v12 = vpop.permute.xlu0 %31   ;;  %v38_v13 = vpop.permute.xlu1 %37  }
  0x7d   :  { %34 = vst.msk [vmem:[#allocation0] sm:$0x1] %vm33_vm5, %v32_v12  }
  0x7e   :  { %40 = vst.msk [vmem:[#allocation0] sm:$0x1] %vm39_vm6, %v38_v13  }
  0x80   :  { %v44_v14 = vpop.permute.xlu0 %43  }
  0x81   :  { %46 = vst.msk [vmem:[#allocation0] sm:$0x1] %vm45_vm7, %v44_v14  }
  0x88   :  { %v51_v15 = vld [vmem:[#allocation0] sm:$0x1] }
  0x89   :  { %54 = vst [vmem:[%s114_s1] sm:$0x1] %v51_v15 }

// kernel: lazy_conv_block.2
= control target key start
LH: loop header
LB: loop body
LE: loop exit
PB: predicated region body
PF: predicated region fallthrough
CT: control target
= control target key end

     0   :  { %v427_v1 = vmov 0.0   ;;  %vm428_vm0 = vmmov 0   ;;  %vm221_vm1 = vcmask 261120   ;;  %s534_s1 = inlined_call_operand.vmem [shape: bf16[288,128], index: 1, kind: input, shape index: {}]   ;;  %s535_s0 = inlined_call_operand.vmem [shape: bf16[16,288], index: 0, kind: input, shape index: {}]   ;;  %s536_s2 = inlined_call_operand.vmem [shape: f32[1,128], index: 2, kind: input, shape index: {}]   ;;  %s537_s3 = inlined_call_operand.vmem [shape: f32[1,128], index: 3, kind: input, shape index: {}]   ;;  %s538_s4 = inlined_call_operand.vmem [shape: f32[1,8,128], index: 4, kind: output, shape index: {0}]   ;;  %s539_s5 = inlined_call_operand.vmem [shape: f32[1,8,128], index: 5, kind: output, shape index: {1}]  }
   0x1   :  { %v405_v0 = vld [vmem:[%s534_s1 + $0x78] sm:$0xff]   ;;  %395 = vmatprep.subr.bf16.mxu1 %v427_v1  ;;  %399 = vmatprep.mubr.msk.bf16.mxu1 %vm428_vm0, %v427_v1  ;;  %v407_v3 = vld [vmem:[%s534_s1 + $0x70] sm:$0xff]   ;;  %v409_v5 = vld [vmem:[%s534_s1 + $0x68] sm:$0xff]  }
   0x2   :  { %v406_v2 = vld [vmem:[%s534_s1 + $0x38] sm:$0xff]   ;;  %370 = vmatprep.subr.bf16.mxu0 %v405_v0  ;;  %v408_v4 = vld [vmem:[%s534_s1 + $0x30] sm:$0xff]   ;;  %v410_v6 = vld [vmem:[%s534_s1 + $0x28] sm:$0xff]  }
   0x3   :  { %371 = vmatpush3.bf16.msra.mxu0 %v406_v2  ;;  %v411_v7 = vld [vmem:[%s534_s1 + $0x60] sm:$0xff]   ;;  %v413_v9 = vld [vmem:[%s534_s1 + $0x58] sm:$0xff]   ;;  %v419_v10 = vld [vmem:[%s534_s1 + $0x88] sm:$0xff]  }
   0x4   :  { %372 = vmatprep.subr.bf16.mxu0 %v407_v3  ;;  %v412_v8 = vld [vmem:[%s534_s1 + $0x20] sm:$0xff]   ;;  %v414_v11 = vld [vmem:[%s534_s1 + $0x18] sm:$0xff]   ;;  %v415_v12 = vld [vmem:[%s534_s1 + $0x50] sm:$0xff]   ;;  %396 = vmatpush3.bf16.msra.mxu1 %v419_v10 }
   0x5   :  { %397 = vmatprep.subr.bf16.mxu1 %v427_v1  ;;  %v422_v13 = vld [vmem:[%s534_s1 + $0x80] sm:$0xff]   ;;  %v416_v14 = vld [vmem:[%s534_s1 + $0x10] sm:$0xff]   ;;  %v417_v16 = vld [vmem:[%s534_s1 + $0x48] sm:$0xff]  }
   0x6   :  { %v425_v15 = vld [vmem:[%s535_s0 + $0x4] ss:$12 sps:$4 sm:$0xff]   ;;  %v426_v17 = vld [vmem:[%s535_s0 + $0x8] ss:$12 sps:$4 sm:$0xff]   ;;  %v423_v21 = vld [vmem:[%s535_s0] ss:$12 sps:$4 sm:$0xff]  }
   0x7   :  { %373 = vmatpush3.bf16.msra.mxu0 %v408_v4  ;;  %257 = vmatprep.mubr.bf16.mxu0 %v425_v15  ;;  %v418_v18 = vld [vmem:[%s534_s1 + $0x8] sm:$0xff]   ;;  %v420_v19 = vld [vmem:[%s534_s1 + $0x40] sm:$0xff]  }
   0x8   :  { %374 = vmatprep.subr.bf16.mxu0 %v409_v5  ;;  %398 = vmatpush3.bf16.msra.mxu1 %v422_v13  ;;  %v421_v20 = vld [vmem:[%s534_s1] sm:$0xff]  }
   0x9   :  { %v346_v27 = vld [vmem:[%s536_s2] ss:$0 sm:$0xff] }
   0xa   :  { %v369_v38 = vld [vmem:[%s537_s3] ss:$0 sm:$0xff] }
   0xb   :  { %375 = vmatpush3.bf16.msra.mxu0 %v410_v6  ;;  %400 = vmatmul.mubr.msk.bf16.vlgmr.msra.gmra.mxu1 %vm221_vm1, %v426_v17 }
   0xc   :  { %376 = vmatprep.subr.bf16.mxu0 %v411_v7 }
   0xf   :  { %377 = vmatpush3.bf16.msra.mxu0 %v412_v8 }
  0x10   :  { %378 = vmatprep.subr.bf16.mxu0 %v413_v9 }
  0x13   :  { %379 = vmatpush3.bf16.msra.mxu0 %v414_v11 }
  0x14   :  { %380 = vmatprep.subr.bf16.mxu0 %v415_v12 }
  0x17   :  { %381 = vmatpush3.bf16.msra.mxu0 %v416_v14 }
  0x18   :  { %382 = vmatprep.subr.bf16.mxu0 %v417_v16 }
  0x1b   :  { %383 = vmatpush3.bf16.msra.mxu0 %v418_v18 }
  0x1c   :  { %384 = vmatprep.subr.bf16.mxu0 %v420_v19 }
  0x1f   :  { %385 = vmatpush3.bf16.msra.mxu0 %v421_v20 }
  0x22   :  { %258 = vmatmul.mubr.bf16.vlgmr.msra.gmra.mxu0 %v423_v21 }
  0xcb   :  { %v300_v22 = vpop.f32.mrf.mxu1 }
  0xcd   :  { %v401_v23 = vpop.f32.mrf.mxu1 }
  0xcf   :  { %v303_v24 = vpop.f32.mrf.mxu1 }
  0xd1   :  { %v402_v25 = vpop.f32.mrf.mxu1 }
  0xe2   :  { %v386_v26 = vpop.f32.mrf.mxu0 }
  0xe4   :  { %v387_v28 = vpop.f32.mrf.mxu0 }
  0xe5   :  { %v388_v29 = vadd.f32 %v387_v28, %v386_v26 }
  0xe6   :  { %v389_v30 = vpop.f32.mrf.mxu0 }
  0xe7   :  { %v260_v31 = vadd.f32 %v388_v29, %v346_v27 }
  0xe8   :  { %v390_v32 = vpop.f32.mrf.mxu0 }
  0xe9   :  { %v301_v33 = vadd.f32 %v300_v22, %v260_v31  ;;  %v391_v34 = vadd.f32 %v390_v32, %v389_v30 }
  0xeb   :  { %vm307_vm2 = vcmp.ge.f32.partialorder %v301_v33, 0.0  ;;  %v309_v35 = vmul.f32 0.01, %v301_v33  ;;  %v263_v36 = vadd.f32 %v391_v34, %v346_v27 }
  0xed   :  { %v311_v37 = vsel %vm307_vm2, %v301_v33, %v309_v35  ;;  %v304_v39 = vadd.f32 %v303_v24, %v263_v36 }
  0xee   :  { %v320_v41 = vsub.f32 %v311_v37, %v369_v38 }
  0xef   :  { %vm308_vm3 = vcmp.ge.f32.partialorder %v304_v39, 0.0  ;;  %v310_v40 = vmul.f32 0.01, %v304_v39 }
  0xf0   :  { %v327_v44 = vmul.f32 %v320_v41, %v320_v41 }
  0xf1   :  { %v312_v42 = vsel %vm308_vm3, %v304_v39, %v310_v40 }
  0xf2   :  { %v321_v43 = vsub.f32 %v312_v42, %v369_v38 }
  0xf4   :  { %v323_v45 = vadd.f32 %v321_v43, %v320_v41  ;;  %v328_v46 = vmul.f32 %v321_v43, %v321_v43 }
  0xf6   :  { %v329_v47 = vadd.f32 %v328_v46, %v327_v44  ;;  %325 = vst [vmem:[%s538_s4] sm:$0xff] %v323_v45 }
  0xf8   :  { %331 = vst [vmem:[%s539_s5] sm:$0xff] %v329_v47 }

// kernel: lazy_conv_block.3
= control target key start
LH: loop header
LB: loop body
LE: loop exit
PB: predicated region body
PF: predicated region fallthrough
CT: control target
= control target key end

     0   :  { %v389_v1 = vmov 0.0   ;;  %vm390_vm0 = vmmov 0   ;;  %vm191_vm1 = vcmask 261120   ;;  %s499_s1 = inlined_call_operand.vmem [shape: bf16[288,128], index: 1, kind: input, shape index: {}]   ;;  %s500_s0 = inlined_call_operand.vmem [shape: bf16[16,288], index: 0, kind: input, shape index: {}]   ;;  %s501_s2 = inlined_call_operand.vmem [shape: f32[1,128], index: 2, kind: input, shape index: {}]   ;;  %s502_s3 = inlined_call_operand.vmem [shape: f32[1,128], index: 3, kind: input, shape index: {}]   ;;  %s503_s4 = inlined_call_operand.vmem [shape: f32[1,128], index: 4, kind: input, shape index: {}]   ;;  %s504_s5 = inlined_call_operand.vmem [shape: f32[16,128], index: 5, kind: output, shape index: {}]  }
   0x1   :  { %v367_v0 = vld [vmem:[%s499_s1 + $0x78] sm:$0xff]   ;;  %357 = vmatprep.subr.bf16.mxu1 %v389_v1  ;;  %361 = vmatprep.mubr.msk.bf16.mxu1 %vm390_vm0, %v389_v1  ;;  %v369_v3 = vld [vmem:[%s499_s1 + $0x70] sm:$0xff]   ;;  %v371_v5 = vld [vmem:[%s499_s1 + $0x68] sm:$0xff]  }
   0x2   :  { %v368_v2 = vld [vmem:[%s499_s1 + $0x38] sm:$0xff]   ;;  %332 = vmatprep.subr.bf16.mxu0 %v367_v0  ;;  %v370_v4 = vld [vmem:[%s499_s1 + $0x30] sm:$0xff]   ;;  %v372_v6 = vld [vmem:[%s499_s1 + $0x28] sm:$0xff]  }
   0x3   :  { %333 = vmatpush3.bf16.msra.mxu0 %v368_v2  ;;  %v373_v7 = vld [vmem:[%s499_s1 + $0x60] sm:$0xff]   ;;  %v375_v9 = vld [vmem:[%s499_s1 + $0x58] sm:$0xff]   ;;  %v381_v10 = vld [vmem:[%s499_s1 + $0x88] sm:$0xff]  }
   0x4   :  { %334 = vmatprep.subr.bf16.mxu0 %v369_v3  ;;  %v374_v8 = vld [vmem:[%s499_s1 + $0x20] sm:$0xff]   ;;  %v376_v11 = vld [vmem:[%s499_s1 + $0x18] sm:$0xff]   ;;  %v377_v12 = vld [vmem:[%s499_s1 + $0x50] sm:$0xff]   ;;  %358 = vmatpush3.bf16.msra.mxu1 %v381_v10 }
   0x5   :  { %359 = vmatprep.subr.bf16.mxu1 %v389_v1  ;;  %v384_v13 = vld [vmem:[%s499_s1 + $0x80] sm:$0xff]   ;;  %v378_v14 = vld [vmem:[%s499_s1 + $0x10] sm:$0xff]   ;;  %v379_v16 = vld [vmem:[%s499_s1 + $0x48] sm:$0xff]  }
   0x6   :  { %v387_v15 = vld [vmem:[%s500_s0 + $0x4] ss:$12 sps:$4 sm:$0xff]   ;;  %v388_v17 = vld [vmem:[%s500_s0 + $0x8] ss:$12 sps:$4 sm:$0xff]   ;;  %v385_v21 = vld [vmem:[%s500_s0] ss:$12 sps:$4 sm:$0xff]  }
   0x7   :  { %335 = vmatpush3.bf16.msra.mxu0 %v370_v4  ;;  %227 = vmatprep.mubr.bf16.mxu0 %v387_v15  ;;  %v380_v18 = vld [vmem:[%s499_s1 + $0x8] sm:$0xff]   ;;  %v382_v19 = vld [vmem:[%s499_s1 + $0x40] sm:$0xff]  }
   0x8   :  { %336 = vmatprep.subr.bf16.mxu0 %v371_v5  ;;  %360 = vmatpush3.bf16.msra.mxu1 %v384_v13  ;;  %v383_v20 = vld [vmem:[%s499_s1] sm:$0xff]  }
   0x9   :  { %v307_v27 = vld [vmem:[%s501_s2] ss:$0 sm:$0xff] }
   0xa   :  { %v330_v36 = vld [vmem:[%s502_s3] ss:$0 sm:$0xff] }
   0xb   :  { %337 = vmatpush3.bf16.msra.mxu0 %v372_v6  ;;  %362 = vmatmul.mubr.msk.bf16.vlgmr.msra.gmra.mxu1 %vm191_vm1, %v388_v17  ;;  %v331_v39 = vld [vmem:[%s503_s4] ss:$0 sm:$0xff] }
   0xc   :  { %338 = vmatprep.subr.bf16.mxu0 %v373_v7 }
   0xf   :  { %339 = vmatpush3.bf16.msra.mxu0 %v374_v8 }
  0x10   :  { %340 = vmatprep.subr.bf16.mxu0 %v375_v9 }
  0x13   :  { %341 = vmatpush3.bf16.msra.mxu0 %v376_v11 }
  0x14   :  { %342 = vmatprep.subr.bf16.mxu0 %v377_v12 }
  0x17   :  { %343 = vmatpush3.bf16.msra.mxu0 %v378_v14 }
  0x18   :  { %344 = vmatprep.subr.bf16.mxu0 %v379_v16 }
  0x1b   :  { %345 = vmatpush3.bf16.msra.mxu0 %v380_v18 }
  0x1c   :  { %346 = vmatprep.subr.bf16.mxu0 %v382_v19 }
  0x1f   :  { %347 = vmatpush3.bf16.msra.mxu0 %v383_v20 }
  0x22   :  { %228 = vmatmul.mubr.bf16.vlgmr.msra.gmra.mxu0 %v385_v21 }
  0xcb   :  { %v270_v22 = vpop.f32.mrf.mxu1 }
  0xcd   :  { %v363_v23 = vpop.f32.mrf.mxu1 }
  0xcf   :  { %v273_v24 = vpop.f32.mrf.mxu1 }
  0xd1   :  { %v364_v25 = vpop.f32.mrf.mxu1 }
  0xe2   :  { %v348_v26 = vpop.f32.mrf.mxu0 }
  0xe4   :  { %v349_v28 = vpop.f32.mrf.mxu0 }
  0xe5   :  { %v350_v29 = vadd.f32 %v349_v28, %v348_v26 }
  0xe6   :  { %v351_v30 = vpop.f32.mrf.mxu0 }
  0xe7   :  { %v230_v31 = vadd.f32 %v350_v29, %v307_v27 }
  0xe8   :  { %v352_v32 = vpop.f32.mrf.mxu0 }
  0xe9   :  { %v271_v33 = vadd.f32 %v270_v22, %v230_v31  ;;  %v353_v34 = vadd.f32 %v352_v32, %v351_v30 }
  0xeb   :  { %vm277_vm2 = vcmp.ge.f32.partialorder %v271_v33, 0.0  ;;  %v279_v35 = vmul.f32 0.01, %v271_v33  ;;  %v233_v37 = vadd.f32 %v353_v34, %v307_v27 }
  0xed   :  { %v281_v38 = vsel %vm277_vm2, %v271_v33, %v279_v35  ;;  %v274_v40 = vadd.f32 %v273_v24, %v233_v37 }
  0xee   :  { %v290_v41 = vmul.f32 %v330_v36, %v281_v38 }
  0xef   :  { %vm278_vm3 = vcmp.ge.f32.partialorder %v274_v40, 0.0  ;;  %v280_v42 = vmul.f32 0.01, %v274_v40 }
  0xf0   :  { %v299_v43 = vadd.f32 %v331_v39, %v290_v41 }
  0xf1   :  { %v282_v44 = vsel %vm278_vm3, %v274_v40, %v280_v42 }
  0xf2   :  { %301 = vst [vmem:[%s504_s5] sm:$0xff] %v299_v43  ;;  %v291_v45 = vmul.f32 %v330_v36, %v282_v44 }
  0xf4   :  { %v300_v46 = vadd.f32 %v331_v39, %v291_v45 }
  0xf6   :  { %302 = vst [vmem:[%s504_s5 + $0x8] sm:$0xff] %v300_v46 }

</bundles_post_ra>
